<compile_context>
chip_gen: v7x
topology: tpu7x:2x2x1
jax: 0.10.0
libtpu: 0.0.40
codegen_flags: <defaults>
</compile_context>

<pallas_src>
import jax
import jax.numpy as jnp
from jax.experimental import pallas as pl
from jax.experimental.pallas import tpu as pltpu


def _round_up(a, m):
    return ((a + m - 1) // m) * m


def _pick_tile(total, target, unit):
    """Tile size: a multiple of `unit`, <= ~target, clamped to `total`, and
    leaving >= 2 grid steps when there is enough work (v7x megacore: a 1-step
    'parallel' grid would leave one TensorCore idle)."""
    total = max(int(total), 1)
    total_u = _round_up(total, unit)
    tile = min(_round_up(max(int(target), 1), unit), total_u)
    if total_u >= 2 * unit and 2 * tile > total_u:
        tile = _round_up(total_u // 2, unit)
    return min(tile, total)


def node_proj_kernel(x_ref, w_ref, proj_ref):
    """proj[k, n] = sum_f w[k, f] * x[n, f]  (row 0 = x@Ws, row 1 = x@Wd).

    x arrives in its native [tile_n, F] layout; the NT dot_general on the idle
    MXU reduces over F and emits the per-node results across lanes, so the
    merged [8, tile_n] output block is lane-dense with no relayout."""
    x = x_ref[...].astype(jnp.float32)            # [tile_n, F]
    w = w_ref[...]                                # [8, F] f32 (rows 2..7 zero)
    proj_ref[...] = jax.lax.dot_general(
        w, x, (((1,), (1,)), ((), ())),           # contract F on both sides (NT)
        preferred_element_type=jnp.float32)       # -> [8, tile_n]


def edge_score_kernel(ps_ref, pd_ref, b_ref, out_ref):
    """score = sigmoid(ps[src] + pd[dst] + b) on dense [tile_r, 128] edge tiles."""
    z = ps_ref[...].astype(jnp.float32) + pd_ref[...].astype(jnp.float32)
    out_ref[...] = jax.nn.sigmoid(z + b_ref[0, 0])


def score_predictor(x, src_idx, dst_idx, w, b, *,
                    node_tile_bytes=2 * 1024 * 1024,
                    edge_tile=256 * 1024,
                    edge_value_dtype=jnp.bfloat16,
                    vmem_limit_bytes=40 * 1024 * 1024):
    """x: [N, F] node features; src_idx/dst_idx: [E] int edge endpoints, which
    MUST lie in [0, N) (JAX clamps out-of-range gather indices silently, unlike
    PyTorch which would raise); w: [1, 2F] Linear weight (PyTorch layout);
    b: [1] Linear bias.  Returns sigmoid scores, shape [E] (f32)."""
    N, F = x.shape
    E = int(src_idx.shape[0])
    if E == 0:  # empty edge set -> empty score vector
        return jnp.zeros((0,), jnp.float32)

    # ---- kernel 1: per-node projections (x read once, native layout/dtype) ----
    # Stack the two halves of W into one 8-row f32 operand so every matmul dim
    # is 8/128-aligned (rows 2..7 are zeros and ignored downstream).
    w8 = jnp.zeros((8, F), jnp.float32)
    w8 = w8.at[0, :].set(w[0, :F].astype(jnp.float32))       # Ws
    w8 = w8.at[1, :].set(w[0, F:].astype(jnp.float32))       # Wd

    itemsize = jnp.dtype(x.dtype).itemsize
    lane_f = max(_round_up(F, 128), 128)      # physical lane footprint of an x row
    tile_n = _pick_tile(N, node_tile_bytes // (lane_f * itemsize), 128)
    grid_n = pl.cdiv(N, tile_n)               # last block may be ragged (masked)

    proj = pl.pallas_call(
        node_proj_kernel,
        out_shape=jax.ShapeDtypeStruct((8, N), jnp.float32),
        grid_spec=pltpu.PrefetchScalarGridSpec(
            num_scalar_prefetch=0,
            grid=(grid_n,),
            in_specs=[
                pl.BlockSpec((tile_n, F), lambda i: (i, 0)),    # x, native [N, F]
                pl.BlockSpec((8, F), lambda i: (0, 0)),         # stacked Ws|Wd
            ],
            out_specs=pl.BlockSpec((8, tile_n), lambda i: (0, i)),
        ),
        compiler_params=pltpu.CompilerParams(
            dimension_semantics=("parallel",),
            vmem_limit_bytes=vmem_limit_bytes),
    )(x, w8)

    # ---- glue: per-edge gather of the node projections ------------------------
    # TODO(synk): the data-dependent per-edge gather has no reliably-lowering
    # in-kernel form (arbitrary-index gather over a large VMEM table), so it
    # stays in XLA.  Per review fallback, the gathered per-edge intermediates
    # are stored as bf16 (projection table itself stays f32).
    rows = pl.cdiv(E, 128)
    e_pad = rows * 128
    src_p = jnp.pad(src_idx.astype(jnp.int32), (0, e_pad - E)).reshape(rows, 128)
    dst_p = jnp.pad(dst_idx.astype(jnp.int32), (0, e_pad - E)).reshape(rows, 128)
    ps_e = proj[0, src_p].astype(edge_value_dtype)             # [rows, 128]
    pd_e = proj[1, dst_p].astype(edge_value_dtype)             # [rows, 128]

    # ---- kernel 2: add + bias + sigmoid on big, lane-dense edge tiles ---------
    tile_r = _pick_tile(rows, max(edge_tile // 128, 1), 32)    # 32-row unit keeps
    grid_e = pl.cdiv(rows, tile_r)                             # f32/bf16 tiling happy
    b2 = b.reshape(1, 1).astype(jnp.float32)

    scores = pl.pallas_call(
        edge_score_kernel,
        out_shape=jax.ShapeDtypeStruct((rows, 128), jnp.float32),
        grid_spec=pltpu.PrefetchScalarGridSpec(
            num_scalar_prefetch=0,
            grid=(grid_e,),
            in_specs=[
                pl.BlockSpec((tile_r, 128), lambda i: (i, 0)),
                pl.BlockSpec((tile_r, 128), lambda i: (i, 0)),
                pl.BlockSpec(memory_space=pltpu.MemorySpace.SMEM),  # bias scalar
            ],
            out_specs=pl.BlockSpec((tile_r, 128), lambda i: (i, 0)),
        ),
        compiler_params=pltpu.CompilerParams(
            dimension_semantics=("parallel",),
            vmem_limit_bytes=vmem_limit_bytes),
    )(ps_e, pd_e, b2)

    # torch.squeeze on [E, 1] -> [E]; drop padding.
    return scores.reshape(-1)[:E]


if __name__ == "__main__":
    key = jax.random.PRNGKey(0)
    k_x, k_src, k_dst, k_w, k_b = jax.random.split(key, 5)

    # Small but non-trivial shapes: both kernels get a 2-step "parallel" grid
    # (exercises the v7x megacore path) with exactly-dividing blocks.
    num_nodes = 256
    in_features = 32
    num_edges = 8192

    x = jax.random.normal(k_x, (num_nodes, in_features), dtype=jnp.float32)
    src_idx = jax.random.randint(k_src, (num_edges,), 0, num_nodes, dtype=jnp.int32)
    dst_idx = jax.random.randint(k_dst, (num_edges,), 0, num_nodes, dtype=jnp.int32)

    # Deterministic Linear(in_features*2, 1) params (PyTorch-style uniform init).
    fan_in = in_features * 2
    bound = 1.0 / jnp.sqrt(fan_in)
    w = jax.random.uniform(k_w, (1, fan_in), minval=-bound, maxval=bound,
                           dtype=jnp.float32)
    b = jax.random.uniform(k_b, (1,), minval=-bound, maxval=bound,
                           dtype=jnp.float32)

    score = score_predictor(x, src_idx, dst_idx, w, b)
    score = jax.block_until_ready(score)

    # Pure-JAX reference (exact module semantics).
    cat = jnp.concatenate([x[src_idx], x[dst_idx]], axis=1)        # [E, 2F]
    ref = jax.nn.sigmoid(cat @ w.T + b).squeeze(-1)                # [E]

    assert score.shape == (num_edges,)
    # Error budget: the gathered per-edge projections are deliberately kept in
    # bf16 (review item), bounding the sigmoid-output error at ~1e-3 absolute;
    # pass edge_value_dtype=jnp.float32 to recover full f32 fidelity.
    max_err = float(jnp.max(jnp.abs(score - ref)))
    assert jnp.allclose(score, ref, atol=5e-3, rtol=0.0), max_err

    print("KERNEL_OK")
</pallas_src>

<mosaic_0001>
module attributes {stable_mosaic.version = 11 : i64} {
  func.func @node_proj_kernel(%arg0: i32, %arg1: memref<128x32xf32, #tpu.memory_space<vmem>>, %arg2: memref<8x32xf32, #tpu.memory_space<vmem>>, %arg3: memref<8x128xf32, #tpu.memory_space<vmem>>) attributes {dimension_semantics = [#tpu.dimension_semantics<parallel>], iteration_bounds = array<i64: 2>, scalar_prefetch = 0 : i64, scratch_operands = 0 : i64, tpu.core_type = #tpu.core_type<tc>, window_params = [{transform_indices = @transform_0, window_bounds = array<i64: 128, 32>}, {pipeline_mode = #tpu.pipeline_mode<synchronous>, transform_indices = @transform_1, window_bounds = array<i64: 8, 32>}, {transform_indices = @transform_2, window_bounds = array<i64: 8, 128>}]} {
    %c0 = arith.constant 0 : index
    %c0_0 = arith.constant 0 : index
    %0 = vector.load %arg1[%c0, %c0_0] : memref<128x32xf32, #tpu.memory_space<vmem>>, vector<128x32xf32>
    %c0_1 = arith.constant 0 : index
    %c0_2 = arith.constant 0 : index
    %1 = vector.load %arg2[%c0_1, %c0_2] : memref<8x32xf32, #tpu.memory_space<vmem>>, vector<8x32xf32>
    %cst = arith.constant dense<0.000000e+00> : vector<8x128xf32>
    %2 = tpu.matmul %1, %0, %cst {dimension_numbers = #tpu.dot_dimension_numbers<[1], [1], [0], [0], [0, 0, 1, 0], [], []>} : vector<8x32xf32>, vector<128x32xf32>, vector<8x128xf32> -> vector<8x128xf32>
    %c0_3 = arith.constant 0 : index
    %c0_4 = arith.constant 0 : index
    %3 = vector.load %arg3[%c0_3, %c0_4] : memref<8x128xf32, #tpu.memory_space<vmem>>, vector<8x128xf32>
    tpu.vector_store %arg3[%c0_3, %c0_4], %2 {strides = array<i32>} : memref<8x128xf32, #tpu.memory_space<vmem>>, vector<8x128xf32>,
    return
  }
  func.func @transform_0(%arg0: i32) -> (i32, i32) {
    %c0_i32 = arith.constant 0 : i32
    %c0_i32_0 = arith.constant 0 : i32
    return %arg0, %c0_i32 : i32, i32
  }
  func.func @transform_1(%arg0: i32) -> (i32, i32) {
    %c0_i32 = arith.constant 0 : i32
    %c0_i32_0 = arith.constant 0 : i32
    %c0_i32_1 = arith.constant 0 : i32
    return %c0_i32, %c0_i32_0 : i32, i32
  }
  func.func @transform_2(%arg0: i32) -> (i32, i32) {
    %c0_i32 = arith.constant 0 : i32
    %c0_i32_0 = arith.constant 0 : i32
    return %c0_i32, %arg0 : i32, i32
  }
}

</mosaic_0001>

<bundles_post_ra>
// kernel: tpu_custom_call.1
= control target key start
LH: loop header
LB: loop body
LE: loop exit
PB: predicated region body
PF: predicated region fallthrough
CT: control target
= control target key end

     0   :  { %7 = vsyncpa [#allocation3], 0  ;;  %s737_s0 = inlined_call_operand.vmem [shape: f32[256,32], index: 0, kind: input, shape index: {}]   ;;  %s738_s1 = inlined_call_operand.vmem [shape: f32[8,32], index: 1, kind: input, shape index: {}]   ;;  %s739_s2 = inlined_call_operand.hbm [shape: f32[8,256], index: 2, kind: output, shape index: {}]  }
   0x1   :  { %9 = vsyncpa [#allocation3 + $0x1], 0  ;;  %s594_s9 = smov 0   ;;  %s596_s10 = smov 0  }
   0x2   :  { %s598_s11 = smov 0   ;;  %s600_s12 = smov 0  }
   0x3 LB: > { %s615_s13 = sadd.s32 4294967295, %s573_s12   ;;  %s357_s14 = sadd.s32 4294967294, %s573_s12   ;;  %s573_s12 = sphi %s600_s12, %s747_s12   ;;  %s569_s11 = sphi %s598_s11, %s746_s11   ;;  %s565_s10 = sphi %s596_s10, %s745_s10   ;;  %s561_s9 = sphi %s594_s9, %s744_s9  }
   0x4   : > { %s619_s15 = sadd.s32 1, %s573_s12   ;;  %s69_s16 = sadd.s32 1, %s569_s11 }
   0x5   : > { %s66_s17 = ssub.s32 %s573_s12, %s619_s15  ;;  %p79_p0 = scmp.ne.s32.totalorder %s569_s11, %s565_s10 }
   0x6   : > { %p67_p1 = scmp.eq.s32.totalorder %s66_s17, 0  ;;  %p80_p2 = scmp.eq.s32.totalorder %s615_s13, 1 }
   0x7   : > { %p85_p3 = scmp.ne.s32.totalorder %s565_s10, %s561_s9  ;;  %p86_p4 = scmp.eq.s32.totalorder %s357_s14, 1 }
   0x8   : > { %s630_s18 = scalar_select %p67_p1, %s569_s11, %s69_s16  }
   0x9   : > { %p632_p5 = por %p80_p2, %p79_p0  ;;  %p636_p6 = por %p86_p4, %p85_p3 }
   0xa   : > { %p360_p7 = scmp.ge.s32.totalorder %s573_s12, 1  ;;  %p116_p8 = scmp.lt.s32.totalorder %s573_s12, 3 }
   0xc   : > { %p117_p9 = pnand %p360_p7, %p116_p8 }
   0xd   : > { %s362_s21 = sshll.u32 (!%p117_p9), %s615_s13, 4  ;;  %v575_v0 = vmov (!%p117_p9), 0.0|0.0   ;;  %vm576_vm0 = vmmov (!%p117_p9), 0   ;;  %v577_v1 = vmov (!%p117_p9), 0.0   ;;  %vm161_vm1 = vcmask (!%p117_p9), 261120   ;;  %v160_v27 = vld [vmem:[%s738_s1] sm:$0xff] (!%p117_p9) }
   0xe   : > { %120 = sbr.rel (%p117_p9) target bundleno = 316 (0x13c), region = 28  ;;  %437 = vmatprep.subr.bf16.mxu0 (!%p117_p9), %v575_v0  ;;  %p139_p10 = scmp.lt.s32.totalorder (!%p117_p9), %s362_s21, 31  ;;  %434 = vmatprep.mubr.msk.f32.mxu0 (!%p117_p9), %vm576_vm0, %v577_v1  ;;  %vm652_vm2 = vmpackc.low (!%p117_p9), %vm161_vm1, %vm161_vm1 }
   0xf   : > { %s135_s28 = sand.u32 (!%p117_p9), 1, %s565_s10   ;;  %s382_s4 = sshll.u32 (!%p117_p9), %s615_s13, 7 }
  0x10   : > { %s361_s29 = sshll.u32 (!%p117_p9), %s135_s28, 3  ;;  %s697_s7 = scalar_lea.hbm (!%p117_p9), %s739_s2, %s382_s4 }
  0x11   : > { %s137_s30 = scalar_lea.vmem (!%p117_p9), [#allocation2], %s361_s29  ;;  %s285_s8 = scalar_lea.sflag (!%p117_p9), [#allocation3], %s135_s28 }
  0x12   : > { %s298_s3 = sshll.u32 (!%p117_p9), %s137_s30, 4  ;;  %s578_s13 = smov (!%p117_p9), [#allocation2]   ;;  %s692_s3 = int_to_ptr.vmem [resolvable:$true] %s298_s3 }
  0x13   : > { %s511_s14 = scalar_lea.vmem (!%p117_p9), %s692_s3, 128  ;;  %s515_s16 = sshll.u32 (!%p117_p9), %s578_s13, 4  ;;  %s516_s16 = int_to_ptr.vmem [resolvable:$false] %s515_s16 }
  0x14   : > { %p512_p11 = scmp.ne.s32.totalorder (!%p117_p9), %s692_s3, %s511_s14  ;;  %s517_s17 = scalar_lea.vmem (!%p117_p9), %s516_s16, 256 }
  0x15   : > { %s749_s21 = smov (!%p139_p10, %s362_s21), 31  ;;  %p518_p0 = scmp.lt.s32.totalorder %s692_s3, %s516_s16 }
  0x16   : > { %s363_s22 = sshll.u32 %s749_s21, 3  ;;  %p513_p12 = pnand %p512_p11, %p632_p5 }
  0x17   : > { %s646_s25 = scalar_lea.vmem %s737_s0, %s363_s22  ;;  %p519_p1 = scmp.lt.s32.totalorder %s517_s17, %s511_s14 }
  0x18   : > { %v144_v2 = vld [vmem:[%s646_s25] sm:$0xff]  ;;  %v145_v3 = vld [vmem:[%s646_s25 + $0x8] sm:$0xff]  ;;  %v146_v6 = vld [vmem:[%s646_s25 + $0x10] sm:$0xff]  ;;  %p514_p13 = pneg %p513_p12 }
  0x19   : > { %v438_v5 = vpack.c.bf16 %v145_v3, %v144_v2  ;;  %v147_v7 = vld [vmem:[%s646_s25 + $0x18] sm:$0xff]  ;;  %v148_v9 = vld [vmem:[%s646_s25 + $0x20] sm:$0xff]  ;;  %v149_v10 = vld [vmem:[%s646_s25 + $0x28] sm:$0xff]  ;;  %p520_p2 = por %p519_p1, %p518_p0 }
  0x1a   : > { %v442_v8 = vpack.c.bf16 %v147_v7, %v146_v6  ;;  %v446_v11 = vpack.c.bf16 %v149_v10, %v148_v9  ;;  %v150_v12 = vld [vmem:[%s646_s25 + $0x30] sm:$0xff]  ;;  %v151_v13 = vld [vmem:[%s646_s25 + $0x38] sm:$0xff]  ;;  %v152_v15 = vld [vmem:[%s646_s25 + $0x40] sm:$0xff] }
  0x1b   : > { %440 = vmatpush3.bf16.xpose.msk.msra.mxu0 %vm652_vm2, %v438_v5  ;;  %v450_v14 = vpack.c.bf16 %v151_v13, %v150_v12  ;;  %v153_v16 = vld [vmem:[%s646_s25 + $0x48] sm:$0xff]  ;;  %v154_v18 = vld [vmem:[%s646_s25 + $0x50] sm:$0xff]  ;;  %v155_v19 = vld [vmem:[%s646_s25 + $0x58] sm:$0xff]  ;;  %p521_p3 = pnand %p520_p2, %p514_p13 }
  0x1c   : > { %441 = vmatprep.subr.bf16.mxu0 %v575_v0  ;;  %v454_v17 = vpack.c.bf16 %v153_v16, %v152_v15  ;;  %v458_v20 = vpack.c.bf16 %v155_v19, %v154_v18  ;;  %v156_v21 = vld [vmem:[%s646_s25 + $0x60] sm:$0xff]  ;;  %v157_v22 = vld [vmem:[%s646_s25 + $0x68] sm:$0xff]  ;;  %v158_v24 = vld [vmem:[%s646_s25 + $0x70] sm:$0xff] }
  0x1d   : > { %v462_v23 = vpack.c.bf16 %v157_v22, %v156_v21  ;;  %v159_v25 = vld [vmem:[%s646_s25 + $0x78] sm:$0xff] }
  0x1e   : > { %v466_v26 = vpack.c.bf16 %v159_v25, %v158_v24 }
  0x23   : > { %444 = vmatpush3.bf16.xpose.msk.msra.mxu0 %vm652_vm2, %v442_v8 }
  0x24   : > { %445 = vmatprep.subr.bf16.mxu0 %v575_v0 }
  0x2b   : > { %448 = vmatpush3.bf16.xpose.msk.msra.mxu0 %vm652_vm2, %v446_v11 }
  0x2c   : > { %449 = vmatprep.subr.bf16.mxu0 %v575_v0 }
  0x33   : > { %452 = vmatpush3.bf16.xpose.msk.msra.mxu0 %vm652_vm2, %v450_v14 }
  0x34   : > { %453 = vmatprep.subr.bf16.mxu0 %v575_v0 }
  0x3b   : > { %456 = vmatpush3.bf16.xpose.msk.msra.mxu0 %vm652_vm2, %v454_v17 }
  0x3c   : > { %457 = vmatprep.subr.bf16.mxu0 %v575_v0 }
  0x43   : > { %460 = vmatpush3.bf16.xpose.msk.msra.mxu0 %vm652_vm2, %v458_v20 }
  0x44   : > { %461 = vmatprep.subr.bf16.mxu0 %v575_v0 }
  0x4b   : > { %464 = vmatpush3.bf16.xpose.msk.msra.mxu0 %vm652_vm2, %v462_v23 }
  0x4c   : > { %465 = vmatprep.subr.bf16.mxu0 %v575_v0 }
  0x53   : > { %468 = vmatpush3.bf16.xpose.msk.msra.mxu0 %vm652_vm2, %v466_v26 }
  0x5a   : > { %435 = vmatmul.mubr.msk.f32.vlgmr.msra.gmra.mrb[0].mxu0 %vm161_vm1, %v160_v27 }
 0x12d   : > { %v279_v28 = vpop.f32.mrb[0].mxu0 }
 0x12e   : > { %283 = vst [vmem:[%s137_s30] sm:$0xff] %v279_v28  ;;  %v436_v29 = vpop.f32.mrb[1].mxu0 }
 0x12f   : > { %524 = shalt.err (!%p521_p3)
}
 0x130   : > { %s525_s21 = scalar_lea.hbm %s697_s7, 128  ;;  %s529_s24 = scalar_lea.hbm %s739_s2, 256 }
 0x131   : > { %p526_p4 = scmp.ne.s32.totalorder %s697_s7, %s525_s21  ;;  %p530_p9 = scmp.lt.u32.totalorder %s697_s7, %s739_s2 }
 0x132   : > { %p531_p10 = scmp.lt.u32.totalorder %s529_s24, %s525_s21  ;;  %p533_p12 = scmp.lt.u32.totalorder %s525_s21, %s697_s7 }
 0x133   : > { %p527_p7 = pnand %p526_p4, %p632_p5 }
 0x134   : > { %p532_p11 = por %p531_p10, %p530_p9 }
 0x135   : > { %p528_p8 = pneg %p527_p7 }
 0x136   : > { %p534_p13 = por %p533_p12, %p532_p11 }
 0x138   : > { %p535_p0 = pnand %p534_p13, %p528_p8 }
 0x13a   : > { %538 = shalt.err (!%p535_p0)
}
 0x13b   : > { %469 = dma.vmem_to_hbm [thread:$0]  (%p632_p5), %s692_s3, 128, %s697_s7, %s285_s8  }
 0x13c PF: > { %p475_p1 = scmp.ge.s32.totalorder %s573_s12, 2  ;;  %s310_s27 = sand.u32 1, %s561_s9  }
 0x13d   : > { %s311_s28 = scalar_lea.sflag [#allocation3], %s310_s27 }
 0x13e   : > { %p472_p2 = pnand %p475_p1, %p636_p6 }
 0x140   : > { %556 = dma.done.wait (!%p472_p2), %s311_s28, 128  }
 0x141   : > { %558 = vsyncadd (!%p472_p2), %s311_s28, 4294967168  ;;  %p12_p3 = scmp.ge.s32.totalorder %s619_s15, 4   ;;  %s744_s9 = smov %s565_s10 }
 0x142   : > { %s745_s10 = smov %s569_s11  ;;  %s746_s11 = smov %s630_s18 }
 0x143   : > { %s747_s12 = smov %s619_s15  ;;  %14 = sbr.rel (!%p12_p3) target bundleno = 3 (0x3), region = 63 }
 0x14a   :  { %316 = vsyncpa [#allocation3], 1 }
 0x14b   :  { %318 = vsyncpa [#allocation3 + $0x1], 1 }

</bundles_post_ra>
